<compile_context>
chip_gen: v6e
topology: v6e:2x2x1
jax: 0.10.0
libtpu: 0.0.40
codegen_flags: <defaults>
</compile_context>

<pallas_src>
import math

import jax
import jax.numpy as jnp
from jax import lax
from jax.experimental import pallas as pl
from jax.experimental.pallas import tpu as pltpu

REPEAT = 64  # hard-coded repeat factor from the torch forward


def _pe_add_kernel(x_ref, pe_ref, o_ref):
    # x_ref:  (TI, L)           -- i-tile of x, pre-flattened to L lanes
    # pe_ref: (S,  L)           -- full pe table, resident in VMEM (constant index)
    # o_ref:  (TI, S, ROWS, L)  -- lane-dense output block
    row = x_ref[...][:, None, :] + pe_ref[...][None, :, :]          # (TI, S, L) small add
    o_ref[...] = jnp.broadcast_to(row[:, :, None, :], o_ref.shape).astype(o_ref.dtype)


def make_pe_buffer(d_model, max_len=512, dtype=jnp.float32):
    """Deterministic sinusoidal table, same math as the torch __init__."""
    position = jnp.arange(max_len, dtype=jnp.float32)[:, None]            # (max_len, 1)
    div_term = jnp.exp(
        jnp.arange(0, d_model, 2, dtype=jnp.float32) * (-math.log(10000.0) / d_model)
    )
    pe = jnp.zeros((max_len, d_model), dtype=jnp.float32)
    pe = pe.at[:, 0::2].set(jnp.sin(position * div_term))
    pe = pe.at[:, 1::2].set(jnp.cos(position * div_term))
    # torch: pe.unsqueeze(0).transpose(0, 1) -> (max_len, 1, d_model)
    return pe[:, None, :].astype(dtype)


def positional_encoding_forward(x, pe_buf):
    """x: (S, B, D); pe_buf: (max_len, 1, D). Returns (S, S, REPEAT*B, D)."""
    S, B, D = x.shape
    max_len = pe_buf.shape[0]
    assert S <= max_len, f"sequence length {S} exceeds max_len {max_len}"

    flat = B * D  # period of the repeat along the flattened trailing axis
    g = math.gcd(flat, 128)
    lane_tile = 128 // g
    if REPEAT % lane_tile == 0:
        L = flat * lane_tile          # lane-dense row width (multiple of 128)
        rows = REPEAT // lane_tile    # sublane-broadcast factor inside the kernel
    else:                             # fallback: still correct, partially masked stores
        lane_tile, L, rows = 1, flat, REPEAT

    # Tiny lane-aligned periodic views of the inputs (layout plumbing only):
    #   x_rep[i, q]  = x[i, (q % flat) // D, q % D]
    #   pe_rep[j, q] = pe[j, q % D]
    x_rep = x.reshape(S, flat)
    pe_rep = jnp.tile(pe_buf[:S, 0, :], (1, flat // D))
    if lane_tile > 1:
        x_rep = jnp.tile(x_rep, (1, lane_tile))
        pe_rep = jnp.tile(pe_rep, (1, lane_tile))

    itemsize = jnp.dtype(x.dtype).itemsize
    row_bytes = S * rows * L * itemsize            # output bytes per i-row
    target = 2 * 1024 * 1024                       # ~2 MiB of output per grid step
    ti = max(1, min(S, target // max(1, row_bytes)))
    if ti < S:                                     # keep sublane-friendly x tiles
        ti = min(S, max(8, (ti // 8) * 8))

    out_block_bytes = ti * S * rows * L * itemsize
    vmem_limit = int(min(max(4 * out_block_bytes + (2 << 20), 8 << 20), 48 << 20))

    out4 = pl.pallas_call(
        _pe_add_kernel,
        out_shape=jax.ShapeDtypeStruct((S, S, rows, L), x.dtype),
        grid=(pl.cdiv(S, ti),),
        in_specs=[
            pl.BlockSpec((ti, L), lambda i: (i, 0)),   # x tile for output rows i (fetched once)
            pl.BlockSpec((S, L), lambda i: (0, 0)),    # pe resident (constant block index)
        ],
        out_specs=pl.BlockSpec((ti, S, rows, L), lambda i: (i, 0, 0, 0)),
        compiler_params=pltpu.CompilerParams(
            dimension_semantics=("parallel",),
            vmem_limit_bytes=vmem_limit,
        ),
    )(x_rep, pe_rep)

    # Contiguous (free) reshape back to the PyTorch output layout.
    return out4.reshape(S, S, REPEAT * B, D)


def reference_forward(x, pe_buf):
    """Pure-JAX mirror of the torch forward for verification."""
    x4 = jnp.tile(x[:, None, :, :], (1, 1, REPEAT, 1))   # (S, 1, 64*B, D)
    return x4 + pe_buf[: x.shape[0]][None]               # -> (S, S, 64*B, D)


if __name__ == "__main__":
    S, B, D = 8, 2, 32
    key = jax.random.PRNGKey(0)
    x = jax.random.normal(key, (S, B, D), dtype=jnp.float32)

    pe_buf = make_pe_buffer(d_model=D, max_len=512)

    out = positional_encoding_forward(x, pe_buf)
    out = jax.block_until_ready(out)

    ref = reference_forward(x, pe_buf)
    assert out.shape == (S, S, REPEAT * B, D), out.shape
    assert jnp.allclose(out, ref, atol=1e-6, rtol=1e-6)

    print("KERNEL_OK")
</pallas_src>

<mosaic_0001>
module attributes {stable_mosaic.version = 11 : i64} {
  func.func @_pe_add_kernel(%arg0: i32, %arg1: memref<8x128xf32, #tpu.memory_space<vmem>>, %arg2: memref<8x128xf32, #tpu.memory_space<vmem>>, %arg3: memref<8x8x32x128xf32, #tpu.memory_space<vmem>>) attributes {dimension_semantics = [#tpu.dimension_semantics<parallel>], iteration_bounds = array<i64: 1>, scalar_prefetch = 0 : i64, scratch_operands = 0 : i64, tpu.core_type = #tpu.core_type<tc>, window_params = [{transform_indices = @transform_0, window_bounds = array<i64: 8, 128>}, {pipeline_mode = #tpu.pipeline_mode<synchronous>, transform_indices = @transform_1, window_bounds = array<i64: 8, 128>}, {transform_indices = @transform_2, window_bounds = array<i64: 8, 8, 32, 128>}]} {
    %c0 = arith.constant 0 : index
    %c0_0 = arith.constant 0 : index
    %0 = vector.load %arg1[%c0, %c0_0] : memref<8x128xf32, #tpu.memory_space<vmem>>, vector<8x128xf32>
    %1 = vector.shape_cast %0 : vector<8x128xf32> to vector<8x1x128xf32>
    %c0_1 = arith.constant 0 : index
    %c0_2 = arith.constant 0 : index
    %2 = vector.load %arg2[%c0_1, %c0_2] : memref<8x128xf32, #tpu.memory_space<vmem>>, vector<8x128xf32>
    %3 = vector.shape_cast %2 : vector<8x128xf32> to vector<1x8x128xf32>
    %4 = vector.broadcast %1 : vector<8x1x128xf32> to vector<8x8x128xf32>
    %5 = vector.broadcast %3 : vector<1x8x128xf32> to vector<8x8x128xf32>
    %6 = arith.addf %4, %5 : vector<8x8x128xf32>
    %7 = vector.shape_cast %6 : vector<8x8x128xf32> to vector<8x8x1x128xf32>
    %8 = vector.shape_cast %7 : vector<8x8x1x128xf32> to vector<8x8x1x128xf32>
    %9 = vector.broadcast %8 : vector<8x8x1x128xf32> to vector<8x8x32x128xf32>
    %c0_3 = arith.constant 0 : index
    %c0_4 = arith.constant 0 : index
    %c0_5 = arith.constant 0 : index
    %c0_6 = arith.constant 0 : index
    %10 = vector.load %arg3[%c0_3, %c0_4, %c0_5, %c0_6] : memref<8x8x32x128xf32, #tpu.memory_space<vmem>>, vector<8x8x32x128xf32>
    tpu.vector_store %arg3[%c0_3, %c0_4, %c0_5, %c0_6], %9 {strides = array<i32>} : memref<8x8x32x128xf32, #tpu.memory_space<vmem>>, vector<8x8x32x128xf32>,
    return
  }
  func.func @transform_0(%arg0: i32) -> (i32, i32) {
    %c0_i32 = arith.constant 0 : i32
    %c0_i32_0 = arith.constant 0 : i32
    return %arg0, %c0_i32 : i32, i32
  }
  func.func @transform_1(%arg0: i32) -> (i32, i32) {
    %c0_i32 = arith.constant 0 : i32
    %c0_i32_0 = arith.constant 0 : i32
    %c0_i32_1 = arith.constant 0 : i32
    return %c0_i32, %c0_i32_0 : i32, i32
  }
  func.func @transform_2(%arg0: i32) -> (i32, i32, i32, i32) {
    %c0_i32 = arith.constant 0 : i32
    %c0_i32_0 = arith.constant 0 : i32
    %c0_i32_1 = arith.constant 0 : i32
    %c0_i32_2 = arith.constant 0 : i32
    return %arg0, %c0_i32, %c0_i32_0, %c0_i32_1 : i32, i32, i32, i32
  }
}

</mosaic_0001>

<bundles_post_ra>
// kernel: tpu_custom_call.1
= control target key start
LH: loop header
LB: loop body
LE: loop exit
PB: predicated region body
PF: predicated region fallthrough
CT: control target
= control target key end

     0   :  { %7 = vsyncpa [#allocation3], 0  ;;  %s1412_s0 = inlined_call_operand.hbm [shape: f32[8,128], index: 0, kind: input, shape index: {}]   ;;  %s1413_s1 = inlined_call_operand.hbm [shape: f32[8,128], index: 1, kind: input, shape index: {}]   ;;  %s1414_s2 = inlined_call_operand.hbm [shape: f32[8,8,32,128], index: 2, kind: output, shape index: {}]  }
   0x1   :  { %8 = vsyncpa [#allocation6], 0 }
   0x2   :  { %9 = vsyncpa [#allocation4], 0  ;;  %s1203_s9 = smov [#allocation2]   ;;  %s1204_s11 = smov [#allocation5]  }
   0x3   :  { %s16_s10 = sshll.u32 %s1203_s9, 4  ;;  %s26_s12 = sshll.u32 %s1204_s11, 4  ;;  %s17_s10 = int_to_ptr.vmem [resolvable:$true] %s16_s10  ;;  %s27_s12 = int_to_ptr.vmem [resolvable:$true] %s26_s12 }
   0x4   :  { %s1145_s13 = scalar_lea.vmem %s17_s10, 128  ;;  %p1150_p1 = scmp.lt.s32.totalorder %s17_s10, %s17_s10 }
   0x5   :  { %p1146_p0 = scmp.ne.s32.totalorder %s17_s10, %s1145_s13  ;;  %p1151_p2 = scmp.lt.s32.totalorder %s1145_s13, %s1145_s13 }
   0x7   :  { %p1152_p3 = por %p1151_p2, %p1150_p1 }
   0x9   :  { %p1153_p4 = pnand %p1152_p3, %p1146_p0 }
   0xb   :  { %1156 = shalt.err (!%p1153_p4)
}
   0xc   :  { %19 = dma.hbm_to_vmem [thread:$0]  %s1412_s0, 128, %s17_s10, [#allocation3]  }
   0xd   :  { %s1165_s16 = scalar_lea.vmem %s27_s12, 128  ;;  %p1170_p6 = scmp.lt.s32.totalorder %s27_s12, %s27_s12 }
   0xe   :  { %p1166_p5 = scmp.ne.s32.totalorder %s27_s12, %s1165_s16  ;;  %p1171_p7 = scmp.lt.s32.totalorder %s1165_s16, %s1165_s16 }
  0x10   :  { %p1172_p8 = por %p1171_p7, %p1170_p6 }
  0x12   :  { %p1173_p9 = pnand %p1172_p8, %p1166_p5 }
  0x14   :  { %1176 = shalt.err (!%p1173_p9)
}
  0x15   :  { %29 = dma.hbm_to_vmem [thread:$0]  %s1413_s1, 128, %s27_s12, [#allocation6]  }
  0x16   :  { %1197 = dma.done.wait [#allocation3], 128  }
  0x17   :  { %1198 = vsyncadd [#allocation3], 4294967168 }
  0x18   :  { %1199 = dma.done.wait [#allocation6], 128  }
  0x19   :  { %1200 = vsyncadd [#allocation6], 4294967168  ;;  %v42_v0 = vlaneseq  ;;  %v1205_v1 = vmov 1966171168   ;;  %v36_v6 = vld [vmem:[#allocation2] sm:$0xff]  ;;  %v1237_v13 = vld [vmem:[#allocation5] sm:$0xff] }
  0x1a   :  { %v40_v2 = vunpack.c.l.s4 %v1205_v1  ;;  %v38_v9 = vcombine.high %v36_v6, %v36_v6  ;;  %s1206_s0 = smov [#allocation7]  }
  0x1b   :  { %v43_v3 = vshrl.u32 %v42_v0, 7  ;;  %s1117_s1 = sshll.u32 %s1206_s0, 4  ;;  %s1118_s1 = int_to_ptr.vmem [resolvable:$true] %s1117_s1 }
  0x1c   :  { %v41_v4 = vunpack.c.0.s8 %v40_v2  ;;  %s1177_s19 = scalar_lea.vmem %s1118_s1, 32768  ;;  %p1182_p11 = scmp.lt.s32.totalorder %s1118_s1, %s1118_s1 }
  0x1d   :  { %v1233_v8 = vsub.s32 0, %v43_v3  ;;  %p1178_p10 = scmp.ne.s32.totalorder %s1118_s1, %s1177_s19  ;;  %p1183_p12 = scmp.lt.s32.totalorder %s1177_s19, %s1177_s19 }
  0x1e   :  { %v1230_v5 = vsub.s32 %v41_v4, %v43_v3 }
  0x1f   :  { %p1184_p13 = por %p1183_p12, %p1182_p11 }
  0x20   :  { %v45_v7 = vrot.slane %v36_v6, %v1230_v5  ;;  %v52_v12 = vrot.slane %v38_v9, %v1230_v5 }
  0x21   :  { %p1185_p0 = pnand %p1184_p13, %p1178_p10 }
  0x22   :  { %v61_v10 = vrot.slane %v45_v7, %v1230_v5  ;;  %v53_v11 = vcombine.high %v45_v7, %v45_v7  ;;  %v68_v17 = vrot.slane %v52_v12, %v1230_v5  ;;  %v54_v18 = vcombine.high %v52_v12, %v52_v12 }
  0x24   :  { %v91_v14 = vrot.slane %v61_v10, %v1233_v8  ;;  %v75_v15 = vrot.slane %v53_v11, %v1230_v5  ;;  %v83_v16 = vcombine.high %v61_v10, %v61_v10  ;;  %v107_v23 = vrot.slane %v68_v17, %v1233_v8 }
  0x25   :  { %v1247_v24 = vrot.slane %v54_v18, %v1230_v5  ;;  %v84_v25 = vcombine.high %v68_v17, %v68_v17 }
  0x26   :  { %v128_v19 = vadd.f32 %v91_v14, %v1237_v13  ;;  %v95_v20 = vrot.slane %v75_v15, %v1233_v8  ;;  %v99_v21 = vrot.slane %v83_v16, %v1233_v8  ;;  %v85_v22 = vcombine.high %v75_v15, %v75_v15 }
  0x27   :  { %v1256_v31 = vadd.f32 %v107_v23, %v1237_v13  ;;  %v111_v32 = vrot.slane %v1247_v24, %v1233_v8  ;;  %v1261_v33 = vrot.slane %v84_v25, %v1233_v8 }
  0x28   :  { %v151_v26 = vrot.slane %v128_v19, %v1230_v5  ;;  %v144_v27 = vcombine.high %v128_v19, %v128_v19  ;;  %v129_v28 = vadd.f32 %v95_v20, %v1237_v13  ;;  %v1252_v29 = vadd.f32 %v99_v21, %v1237_v13 }
  0x29   :  { %v103_v30 = vrot.slane %v85_v22, %v1233_v8 }
  0x2a   :  { %v167_v34 = vrot.slane %v151_v26, %v1230_v5  ;;  %v159_v35 = vcombine.high %v151_v26, %v151_v26  ;;  %v158_v36 = vrot.slane %v144_v27, %v1230_v5  ;;  %v200_v37 = vrot.slane %v129_v28, %v1230_v5 }
  0x2b   :  { %v193_v38 = vcombine.high %v129_v28, %v129_v28  ;;  %v1268_v39 = vrot.slane %v1252_v29, %v1230_v5  ;;  %v242_v40 = vcombine.high %v1252_v29, %v1252_v29  ;;  %v1273_v41 = vadd.f32 %v103_v30, %v1237_v13 }
  0x2c   :  { %v539_v42 = vrot.slane %v167_v34, %v1233_v8  ;;  %v181_v43 = vrot.slane %v159_v35, %v1230_v5  ;;  %v189_v44 = vcombine.high %v167_v34, %v167_v34  ;;  %v174_v45 = vrot.slane %v158_v36, %v1230_v5 }
  0x2d   :  { %v160_v46 = vcombine.high %v158_v36, %v158_v36  ;;  %v216_v47 = vrot.slane %v200_v37, %v1230_v5  ;;  %v208_v48 = vcombine.high %v200_v37, %v200_v37  ;;  %v207_v49 = vrot.slane %v193_v38, %v1230_v5 }
  0x2e   :  { %856 = vst [vmem:[#allocation7] sm:$0xff] %v539_v42  ;;  %857 = vst [vmem:[#allocation7 + $0x8] sm:$0xff] %v539_v42  ;;  %v543_v50 = vrot.slane %v181_v43, %v1233_v8  ;;  %v547_v51 = vrot.slane %v189_v44, %v1233_v8  ;;  %v191_v52 = vcombine.high %v181_v43, %v181_v43 }
  0x2f   :  { %858 = vst [vmem:[#allocation7 + $0x10] sm:$0xff] %v539_v42  ;;  %859 = vst [vmem:[#allocation7 + $0x18] sm:$0xff] %v539_v42  ;;  %v555_v53 = vrot.slane %v174_v45, %v1233_v8  ;;  %v188_v54 = vrot.slane %v160_v46, %v1230_v5  ;;  %v190_v55 = vcombine.high %v174_v45, %v174_v45 }
  0x30   :  { %v571_v56 = vrot.slane %v216_v47, %v1233_v8  ;;  %v230_v57 = vrot.slane %v208_v48, %v1230_v5  ;;  %860 = vst [vmem:[#allocation7 + $0x20] sm:$0xff] %v543_v50  ;;  %861 = vst [vmem:[#allocation7 + $0x28] sm:$0xff] %v543_v50  ;;  %v551_v58 = vrot.slane %v191_v52, %v1233_v8 }
  0x31   :  { %862 = vst [vmem:[#allocation7 + $0x30] sm:$0xff] %v543_v50  ;;  %863 = vst [vmem:[#allocation7 + $0x38] sm:$0xff] %v543_v50  ;;  %v238_v59 = vcombine.high %v216_v47, %v216_v47  ;;  %v223_v60 = vrot.slane %v207_v49, %v1230_v5  ;;  %v209_v61 = vcombine.high %v207_v49, %v207_v49 }
  0x32   :  { %864 = vst [vmem:[#allocation7 + $0x40] sm:$0xff] %v547_v51  ;;  %865 = vst [vmem:[#allocation7 + $0x48] sm:$0xff] %v547_v51  ;;  %v559_v62 = vrot.slane %v188_v54, %v1233_v8  ;;  %v563_v63 = vrot.slane %v190_v55, %v1233_v8  ;;  %v192_v0 = vcombine.high %v188_v54, %v188_v54 }
  0x33   :  { %866 = vst [vmem:[#allocation7 + $0x50] sm:$0xff] %v547_v51  ;;  %867 = vst [vmem:[#allocation7 + $0x58] sm:$0xff] %v547_v51  ;;  %v575_v1 = vrot.slane %v230_v57, %v1233_v8  ;;  %v579_v2 = vrot.slane %v238_v59, %v1233_v8  ;;  %v240_v3 = vcombine.high %v230_v57, %v230_v57 }
  0x34   :  { %872 = vst [vmem:[#allocation7 + $0x80] sm:$0xff] %v555_v53  ;;  %873 = vst [vmem:[#allocation7 + $0x88] sm:$0xff] %v555_v53  ;;  %v587_v4 = vrot.slane %v223_v60, %v1233_v8  ;;  %v237_v6 = vrot.slane %v209_v61, %v1230_v5  ;;  %v567_v7 = vrot.slane %v192_v0, %v1233_v8 }
  0x35   :  { %874 = vst [vmem:[#allocation7 + $0x90] sm:$0xff] %v555_v53  ;;  %875 = vst [vmem:[#allocation7 + $0x98] sm:$0xff] %v555_v53  ;;  %v239_v9 = vcombine.high %v223_v60, %v223_v60  ;;  %v265_v10 = vrot.slane %v1268_v39, %v1230_v5  ;;  %v257_v11 = vcombine.high %v1268_v39, %v1268_v39 }
  0x36   :  { %888 = vst [vmem:[#allocation7 + $0x100] sm:$0xff] %v571_v56  ;;  %889 = vst [vmem:[#allocation7 + $0x108] sm:$0xff] %v571_v56  ;;  %v583_v12 = vrot.slane %v240_v3, %v1233_v8  ;;  %v591_v14 = vrot.slane %v237_v6, %v1233_v8  ;;  %v241_v15 = vcombine.high %v237_v6, %v237_v6 }
  0x37   :  { %890 = vst [vmem:[#allocation7 + $0x110] sm:$0xff] %v571_v56  ;;  %891 = vst [vmem:[#allocation7 + $0x118] sm:$0xff] %v571_v56  ;;  %v256_v16 = vrot.slane %v242_v40, %v1230_v5  ;;  %v595_v17 = vrot.slane %v239_v9, %v1233_v8  ;;  %v603_v18 = vrot.slane %v265_v10, %v1233_v8 }
  0x38   :  { %868 = vst [vmem:[#allocation7 + $0x60] sm:$0xff] %v551_v58  ;;  %869 = vst [vmem:[#allocation7 + $0x68] sm:$0xff] %v551_v58  ;;  %v279_v19 = vrot.slane %v257_v11, %v1230_v5  ;;  %v287_v20 = vcombine.high %v265_v10, %v265_v10  ;;  %v599_v21 = vrot.slane %v241_v15, %v1233_v8 }
  0x39   :  { %870 = vst [vmem:[#allocation7 + $0x70] sm:$0xff] %v551_v58  ;;  %871 = vst [vmem:[#allocation7 + $0x78] sm:$0xff] %v551_v58  ;;  %v272_v22 = vrot.slane %v256_v16, %v1230_v5  ;;  %v258_v23 = vcombine.high %v256_v16, %v256_v16  ;;  %v298_v25 = vrot.slane %v1273_v41, %v1230_v5 }
  0x3a   :  { %876 = vst [vmem:[#allocation7 + $0xa0] sm:$0xff] %v559_v62  ;;  %877 = vst [vmem:[#allocation7 + $0xa8] sm:$0xff] %v559_v62  ;;  %v607_v26 = vrot.slane %v279_v19, %v1233_v8  ;;  %v611_v27 = vrot.slane %v287_v20, %v1233_v8  ;;  %v289_v28 = vcombine.high %v279_v19, %v279_v19 }
  0x3b   :  { %878 = vst [vmem:[#allocation7 + $0xb0] sm:$0xff] %v559_v62  ;;  %879 = vst [vmem:[#allocation7 + $0xb8] sm:$0xff] %v559_v62  ;;  %v291_v29 = vcombine.high %v1273_v41, %v1273_v41  ;;  %v619_v30 = vrot.slane %v272_v22, %v1233_v8  ;;  %v286_v34 = vrot.slane %v258_v23, %v1230_v5 }
  0x3c   :  { %880 = vst [vmem:[#allocation7 + $0xc0] sm:$0xff] %v563_v63  ;;  %881 = vst [vmem:[#allocation7 + $0xc8] sm:$0xff] %v563_v63  ;;  %v288_v35 = vcombine.high %v272_v22, %v272_v22  ;;  %v314_v36 = vrot.slane %v298_v25, %v1230_v5  ;;  %v615_v37 = vrot.slane %v289_v28, %v1233_v8 }
  0x3d   :  { %882 = vst [vmem:[#allocation7 + $0xd0] sm:$0xff] %v563_v63  ;;  %883 = vst [vmem:[#allocation7 + $0xd8] sm:$0xff] %v563_v63  ;;  %v306_v38 = vcombine.high %v298_v25, %v298_v25  ;;  %v305_v39 = vrot.slane %v291_v29, %v1230_v5  ;;  %v347_v40 = vrot.slane %v1256_v31, %v1230_v5 }
  0x3e   :  { %892 = vst [vmem:[#allocation7 + $0x120] sm:$0xff] %v575_v1  ;;  %893 = vst [vmem:[#allocation7 + $0x128] sm:$0xff] %v575_v1  ;;  %v623_v41 = vrot.slane %v286_v34, %v1233_v8  ;;  %v627_v42 = vrot.slane %v288_v35, %v1233_v8  ;;  %v290_v43 = vcombine.high %v286_v34, %v286_v34 }
  0x3f   :  { %894 = vst [vmem:[#allocation7 + $0x130] sm:$0xff] %v575_v1  ;;  %895 = vst [vmem:[#allocation7 + $0x138] sm:$0xff] %v575_v1  ;;  %v635_v44 = vrot.slane %v314_v36, %v1233_v8  ;;  %v328_v45 = vrot.slane %v306_v38, %v1230_v5  ;;  %v336_v46 = vcombine.high %v314_v36, %v314_v36 }
  0x40   :  { %896 = vst [vmem:[#allocation7 + $0x140] sm:$0xff] %v579_v2  ;;  %897 = vst [vmem:[#allocation7 + $0x148] sm:$0xff] %v579_v2  ;;  %v321_v47 = vrot.slane %v305_v39, %v1230_v5  ;;  %v307_v48 = vcombine.high %v305_v39, %v305_v39  ;;  %v631_v49 = vrot.slane %v290_v43, %v1233_v8 }
  0x41   :  { %898 = vst [vmem:[#allocation7 + $0x150] sm:$0xff] %v579_v2  ;;  %899 = vst [vmem:[#allocation7 + $0x158] sm:$0xff] %v579_v2  ;;  %v363_v50 = vrot.slane %v347_v40, %v1230_v5  ;;  %v355_v51 = vcombine.high %v347_v40, %v347_v40  ;;  %v340_v52 = vcombine.high %v1256_v31, %v1256_v31 }
  0x42   :  { %904 = vst [vmem:[#allocation7 + $0x180] sm:$0xff] %v587_v4  ;;  %905 = vst [vmem:[#allocation7 + $0x188] sm:$0xff] %v587_v4  ;;  %v639_v53 = vrot.slane %v328_v45, %v1233_v8  ;;  %v643_v54 = vrot.slane %v336_v46, %v1233_v8  ;;  %v338_v55 = vcombine.high %v328_v45, %v328_v45 }
  0x43   :  { %906 = vst [vmem:[#allocation7 + $0x190] sm:$0xff] %v587_v4  ;;  %907 = vst [vmem:[#allocation7 + $0x198] sm:$0xff] %v587_v4  ;;  %v651_v56 = vrot.slane %v321_v47, %v1233_v8  ;;  %v335_v57 = vrot.slane %v307_v48, %v1230_v5  ;;  %v337_v58 = vcombine.high %v321_v47, %v321_v47 }
  0x44   :  { %884 = vst [vmem:[#allocation7 + $0xe0] sm:$0xff] %v567_v7  ;;  %885 = vst [vmem:[#allocation7 + $0xe8] sm:$0xff] %v567_v7  ;;  %v667_v59 = vrot.slane %v363_v50, %v1233_v8  ;;  %v377_v60 = vrot.slane %v355_v51, %v1230_v5  ;;  %v647_v31 = vrot.slane %v338_v55, %v1233_v8 }
  0x45   :  { %886 = vst [vmem:[#allocation7 + $0xf0] sm:$0xff] %v567_v7  ;;  %887 = vst [vmem:[#allocation7 + $0xf8] sm:$0xff] %v567_v7  ;;  %v385_v61 = vcombine.high %v363_v50, %v363_v50  ;;  %v354_v62 = vrot.slane %v340_v52, %v1230_v5  ;;  %v133_v63 = vadd.f32 %v111_v32, %v1237_v13 }
  0x46   :  { %900 = vst [vmem:[#allocation7 + $0x160] sm:$0xff] %v583_v12  ;;  %901 = vst [vmem:[#allocation7 + $0x168] sm:$0xff] %v583_v12  ;;  %v655_v0 = vrot.slane %v335_v57, %v1233_v8  ;;  %v659_v1 = vrot.slane %v337_v58, %v1233_v8  ;;  %v339_v2 = vcombine.high %v335_v57, %v335_v57 }
  0x47   :  { %902 = vst [vmem:[#allocation7 + $0x170] sm:$0xff] %v583_v12  ;;  %903 = vst [vmem:[#allocation7 + $0x178] sm:$0xff] %v583_v12  ;;  %v671_v3 = vrot.slane %v377_v60, %v1233_v8  ;;  %v675_v4 = vrot.slane %v385_v61, %v1233_v8  ;;  %v387_v6 = vcombine.high %v377_v60, %v377_v60 }
  0x48   :  { %908 = vst [vmem:[#allocation7 + $0x1a0] sm:$0xff] %v591_v14  ;;  %909 = vst [vmem:[#allocation7 + $0x1a8] sm:$0xff] %v591_v14  ;;  %v370_v32 = vrot.slane %v354_v62, %v1230_v5  ;;  %v356_v7 = vcombine.high %v354_v62, %v354_v62  ;;  %v663_v9 = vrot.slane %v339_v2, %v1233_v8 }
  0x49   :  { %910 = vst [vmem:[#allocation7 + $0x1b0] sm:$0xff] %v591_v14  ;;  %911 = vst [vmem:[#allocation7 + $0x1b8] sm:$0xff] %v591_v14  ;;  %v396_v10 = vrot.slane %v133_v63, %v1230_v5  ;;  %v389_v11 = vcombine.high %v133_v63, %v133_v63  ;;  %v1353_v12 = vadd.f32 %v1261_v33, %v1237_v13 }
  0x4a   :  { %912 = vst [vmem:[#allocation7 + $0x1c0] sm:$0xff] %v595_v17  ;;  %913 = vst [vmem:[#allocation7 + $0x1c8] sm:$0xff] %v595_v17  ;;  %v679_v14 = vrot.slane %v387_v6, %v1233_v8  ;;  %v683_v15 = vrot.slane %v370_v32, %v1233_v8  ;;  %v384_v16 = vrot.slane %v356_v7, %v1230_v5 }
  0x4b   :  { %914 = vst [vmem:[#allocation7 + $0x1d0] sm:$0xff] %v595_v17  ;;  %915 = vst [vmem:[#allocation7 + $0x1d8] sm:$0xff] %v595_v17  ;;  %v386_v17 = vcombine.high %v370_v32, %v370_v32  ;;  %v404_v19 = vcombine.high %v396_v10, %v396_v10  ;;  %v403_v33 = vrot.slane %v389_v11, %v1230_v5 }
  0x4c   :  { %920 = vst [vmem:[#allocation7 + $0x200] sm:$0xff] %v603_v18  ;;  %921 = vst [vmem:[#allocation7 + $0x208] sm:$0xff] %v603_v18  ;;  %v445_v20 = vrot.slane %v1353_v12, %v1230_v5  ;;  %v388_v23 = vcombine.high %v384_v16, %v384_v16  ;;  %v438_v25 = vcombine.high %v1353_v12, %v1353_v12 }
  0x4d   :  { %922 = vst [vmem:[#allocation7 + $0x210] sm:$0xff] %v603_v18  ;;  %923 = vst [vmem:[#allocation7 + $0x218] sm:$0xff] %v603_v18  ;;  %v412_v18 = vrot.slane %v396_v10, %v1230_v5  ;;  %v691_v22 = vrot.slane %v386_v17, %v1233_v8  ;;  %v419_v29 = vrot.slane %v403_v33, %v1230_v5 }
  0x4e   :  { %916 = vst [vmem:[#allocation7 + $0x1e0] sm:$0xff] %v599_v21  ;;  %917 = vst [vmem:[#allocation7 + $0x1e8] sm:$0xff] %v599_v21  ;;  %v405_v34 = vcombine.high %v403_v33, %v403_v33  ;;  %v461_v35 = vrot.slane %v445_v20, %v1230_v5  ;;  %v453_v36 = vcombine.high %v445_v20, %v445_v20 }
  0x4f   :  { %918 = vst [vmem:[#allocation7 + $0x1f0] sm:$0xff] %v599_v21  ;;  %919 = vst [vmem:[#allocation7 + $0x1f8] sm:$0xff] %v599_v21  ;;  %v687_v21 = vrot.slane %v384_v16, %v1233_v8  ;;  %v434_v28 = vcombine.high %v412_v18, %v412_v18  ;;  %v715_v40 = vrot.slane %v419_v29, %v1233_v8 }
  0x50   :  { %924 = vst [vmem:[#allocation7 + $0x220] sm:$0xff] %v607_v26  ;;  %925 = vst [vmem:[#allocation7 + $0x228] sm:$0xff] %v607_v26  ;;  %v731_v43 = vrot.slane %v461_v35, %v1233_v8  ;;  %v483_v46 = vcombine.high %v461_v35, %v461_v35  ;;  %v452_v47 = vrot.slane %v438_v25, %v1230_v5 }
  0x51   :  { %926 = vst [vmem:[#allocation7 + $0x230] sm:$0xff] %v607_v26  ;;  %927 = vst [vmem:[#allocation7 + $0x238] sm:$0xff] %v607_v26  ;;  %v699_v26 = vrot.slane %v412_v18, %v1233_v8  ;;  %v707_v38 = vrot.slane %v434_v28, %v1233_v8  ;;  %v86_v48 = vcombine.high %v1247_v24, %v1247_v24 }
  0x52   :  { %928 = vst [vmem:[#allocation7 + $0x240] sm:$0xff] %v611_v27  ;;  %929 = vst [vmem:[#allocation7 + $0x248] sm:$0xff] %v611_v27  ;;  %v468_v24 = vrot.slane %v452_v47, %v1230_v5  ;;  %v454_v55 = vcombine.high %v452_v47, %v452_v47 }
  0x53   :  { %930 = vst [vmem:[#allocation7 + $0x250] sm:$0xff] %v611_v27  ;;  %931 = vst [vmem:[#allocation7 + $0x258] sm:$0xff] %v611_v27  ;;  %v426_v27 = vrot.slane %v404_v19, %v1230_v5  ;;  %v119_v57 = vrot.slane %v86_v48, %v1233_v8 }
  0x54   :  { %936 = vst [vmem:[#allocation7 + $0x280] sm:$0xff] %v619_v30  ;;  %937 = vst [vmem:[#allocation7 + $0x288] sm:$0xff] %v619_v30  ;;  %v482_v60 = vrot.slane %v454_v55, %v1230_v5 }
  0x55   :  { %938 = vst [vmem:[#allocation7 + $0x290] sm:$0xff] %v619_v30  ;;  %939 = vst [vmem:[#allocation7 + $0x298] sm:$0xff] %v619_v30  ;;  %v695_v30 = vrot.slane %v388_v23, %v1233_v8  ;;  %v436_v39 = vcombine.high %v426_v27, %v426_v27  ;;  %v135_v61 = vadd.f32 %v119_v57, %v1237_v13 }
  0x56   :  { %932 = vst [vmem:[#allocation7 + $0x260] sm:$0xff] %v615_v37  ;;  %933 = vst [vmem:[#allocation7 + $0x268] sm:$0xff] %v615_v37  ;;  %v751_v62 = vrot.slane %v482_v60, %v1233_v8 }
  0x57   :  { %934 = vst [vmem:[#allocation7 + $0x270] sm:$0xff] %v615_v37  ;;  %935 = vst [vmem:[#allocation7 + $0x278] sm:$0xff] %v615_v37  ;;  %v703_v37 = vrot.slane %v426_v27, %v1233_v8  ;;  %v711_v45 = vrot.slane %v436_v39, %v1233_v8  ;;  %v487_v2 = vcombine.high %v135_v61, %v135_v61 }
  0x58   :  { %940 = vst [vmem:[#allocation7 + $0x2a0] sm:$0xff] %v623_v41  ;;  %941 = vst [vmem:[#allocation7 + $0x2a8] sm:$0xff] %v623_v41 }
  0x59   :  { %942 = vst [vmem:[#allocation7 + $0x2b0] sm:$0xff] %v623_v41  ;;  %943 = vst [vmem:[#allocation7 + $0x2b8] sm:$0xff] %v623_v41  ;;  %v433_v41 = vrot.slane %v405_v34, %v1230_v5  ;;  %v501_v6 = vrot.slane %v487_v2, %v1230_v5 }
  0x5a   :  { %944 = vst [vmem:[#allocation7 + $0x2c0] sm:$0xff] %v627_v42  ;;  %945 = vst [vmem:[#allocation7 + $0x2c8] sm:$0xff] %v627_v42 }
  0x5b   :  { %946 = vst [vmem:[#allocation7 + $0x2d0] sm:$0xff] %v627_v42  ;;  %947 = vst [vmem:[#allocation7 + $0x2d8] sm:$0xff] %v627_v42  ;;  %v435_v42 = vcombine.high %v419_v29, %v419_v29  ;;  %v437_v51 = vcombine.high %v433_v41, %v433_v41  ;;  %v517_v10 = vrot.slane %v501_v6, %v1230_v5 }
  0x5c   :  { %952 = vst [vmem:[#allocation7 + $0x300] sm:$0xff] %v635_v44  ;;  %953 = vst [vmem:[#allocation7 + $0x308] sm:$0xff] %v635_v44  ;;  %v503_v11 = vcombine.high %v501_v6, %v501_v6 }
  0x5d   :  { %954 = vst [vmem:[#allocation7 + $0x310] sm:$0xff] %v635_v44  ;;  %955 = vst [vmem:[#allocation7 + $0x318] sm:$0xff] %v635_v44  ;;  %v475_v44 = vrot.slane %v453_v36, %v1230_v5  ;;  %v723_v50 = vrot.slane %v435_v42, %v1233_v8  ;;  %v779_v16 = vrot.slane %v517_v10, %v1233_v8 }
  0x5e   :  { %948 = vst [vmem:[#allocation7 + $0x2e0] sm:$0xff] %v631_v49  ;;  %949 = vst [vmem:[#allocation7 + $0x2e8] sm:$0xff] %v631_v49  ;;  %v531_v17 = vrot.slane %v503_v11, %v1230_v5  ;;  %v533_v18 = vcombine.high %v517_v10, %v517_v10 }
  0x5f   :  { %950 = vst [vmem:[#allocation7 + $0x2f0] sm:$0xff] %v631_v49  ;;  %951 = vst [vmem:[#allocation7 + $0x2f8] sm:$0xff] %v631_v49  ;;  %v719_v49 = vrot.slane %v433_v41, %v1233_v8  ;;  %v735_v52 = vrot.slane %v475_v44, %v1233_v8 }
  0x60   :  { %956 = vst [vmem:[#allocation7 + $0x320] sm:$0xff] %v639_v53  ;;  %957 = vst [vmem:[#allocation7 + $0x328] sm:$0xff] %v639_v53  ;;  %v783_v33 = vrot.slane %v531_v17, %v1233_v8  ;;  %v535_v20 = vcombine.high %v531_v17, %v531_v17 }
  0x61   :  { %958 = vst [vmem:[#allocation7 + $0x330] sm:$0xff] %v639_v53  ;;  %959 = vst [vmem:[#allocation7 + $0x338] sm:$0xff] %v639_v53  ;;  %v739_v53 = vrot.slane %v483_v46, %v1233_v8 }
  0x62   :  { %960 = vst [vmem:[#allocation7 + $0x340] sm:$0xff] %v643_v54  ;;  %961 = vst [vmem:[#allocation7 + $0x348] sm:$0xff] %v643_v54 }
  0x63   :  { %962 = vst [vmem:[#allocation7 + $0x350] sm:$0xff] %v643_v54  ;;  %963 = vst [vmem:[#allocation7 + $0x358] sm:$0xff] %v643_v54  ;;  %v485_v54 = vcombine.high %v475_v44, %v475_v44 }
  0x64   :  { %968 = vst [vmem:[#allocation7 + $0x380] sm:$0xff] %v651_v56  ;;  %969 = vst [vmem:[#allocation7 + $0x388] sm:$0xff] %v651_v56 }
  0x65   :  { %970 = vst [vmem:[#allocation7 + $0x390] sm:$0xff] %v651_v56  ;;  %971 = vst [vmem:[#allocation7 + $0x398] sm:$0xff] %v651_v56  ;;  %v727_v56 = vrot.slane %v437_v51, %v1233_v8  ;;  %v743_v58 = vrot.slane %v485_v54, %v1233_v8 }
  0x66   :  { %984 = vst [vmem:[#allocation7 + $0x400] sm:$0xff] %v667_v59  ;;  %985 = vst [vmem:[#allocation7 + $0x408] sm:$0xff] %v667_v59 }
  0x67   :  { %986 = vst [vmem:[#allocation7 + $0x410] sm:$0xff] %v667_v59  ;;  %987 = vst [vmem:[#allocation7 + $0x418] sm:$0xff] %v667_v59  ;;  %v747_v59 = vrot.slane %v468_v24, %v1233_v8 }
  0x68   :  { %964 = vst [vmem:[#allocation7 + $0x360] sm:$0xff] %v647_v31  ;;  %965 = vst [vmem:[#allocation7 + $0x368] sm:$0xff] %v647_v31 }
  0x69   :  { %966 = vst [vmem:[#allocation7 + $0x370] sm:$0xff] %v647_v31  ;;  %967 = vst [vmem:[#allocation7 + $0x378] sm:$0xff] %v647_v31  ;;  %v484_v31 = vcombine.high %v468_v24, %v468_v24 }
  0x6a   :  { %972 = vst [vmem:[#allocation7 + $0x3a0] sm:$0xff] %v655_v0  ;;  %973 = vst [vmem:[#allocation7 + $0x3a8] sm:$0xff] %v655_v0 }
  0x6b   :  { %974 = vst [vmem:[#allocation7 + $0x3b0] sm:$0xff] %v655_v0  ;;  %975 = vst [vmem:[#allocation7 + $0x3b8] sm:$0xff] %v655_v0  ;;  %v755_v63 = vrot.slane %v484_v31, %v1233_v8  ;;  %v486_v0 = vcombine.high %v482_v60, %v482_v60 }
  0x6c   :  { %976 = vst [vmem:[#allocation7 + $0x3c0] sm:$0xff] %v659_v1  ;;  %977 = vst [vmem:[#allocation7 + $0x3c8] sm:$0xff] %v659_v1 }
  0x6d   :  { %978 = vst [vmem:[#allocation7 + $0x3d0] sm:$0xff] %v659_v1  ;;  %979 = vst [vmem:[#allocation7 + $0x3d8] sm:$0xff] %v659_v1  ;;  %v494_v1 = vrot.slane %v135_v61, %v1230_v5  ;;  %v759_v13 = vrot.slane %v486_v0, %v1233_v8 }
  0x6e   :  { %988 = vst [vmem:[#allocation7 + $0x420] sm:$0xff] %v671_v3  ;;  %989 = vst [vmem:[#allocation7 + $0x428] sm:$0xff] %v671_v3 }
  0x6f   :  { %990 = vst [vmem:[#allocation7 + $0x430] sm:$0xff] %v671_v3  ;;  %991 = vst [vmem:[#allocation7 + $0x438] sm:$0xff] %v671_v3  ;;  %v510_v3 = vrot.slane %v494_v1, %v1230_v5 }
  0x70   :  { %992 = vst [vmem:[#allocation7 + $0x440] sm:$0xff] %v675_v4  ;;  %993 = vst [vmem:[#allocation7 + $0x448] sm:$0xff] %v675_v4 }
  0x71   :  { %994 = vst [vmem:[#allocation7 + $0x450] sm:$0xff] %v675_v4  ;;  %995 = vst [vmem:[#allocation7 + $0x458] sm:$0xff] %v675_v4  ;;  %v502_v4 = vcombine.high %v494_v1, %v494_v1  ;;  %v763_v32 = vrot.slane %v510_v3, %v1233_v8 }
  0x72   :  { %980 = vst [vmem:[#allocation7 + $0x3e0] sm:$0xff] %v663_v9  ;;  %981 = vst [vmem:[#allocation7 + $0x3e8] sm:$0xff] %v663_v9 }
  0x73   :  { %982 = vst [vmem:[#allocation7 + $0x3f0] sm:$0xff] %v663_v9  ;;  %983 = vst [vmem:[#allocation7 + $0x3f8] sm:$0xff] %v663_v9  ;;  %v524_v7 = vrot.slane %v502_v4, %v1230_v5  ;;  %v532_v9 = vcombine.high %v510_v3, %v510_v3  ;;  %v787_v5 = vrot.slane %v533_v18, %v1233_v8 }
  0x74   :  { %996 = vst [vmem:[#allocation7 + $0x460] sm:$0xff] %v679_v14  ;;  %997 = vst [vmem:[#allocation7 + $0x468] sm:$0xff] %v679_v14 }
  0x75   :  { %998 = vst [vmem:[#allocation7 + $0x470] sm:$0xff] %v679_v14  ;;  %999 = vst [vmem:[#allocation7 + $0x478] sm:$0xff] %v679_v14  ;;  %v767_v12 = vrot.slane %v524_v7, %v1233_v8  ;;  %v771_v14 = vrot.slane %v532_v9, %v1233_v8 }
  0x76   :  { %1000 = vst [vmem:[#allocation7 + $0x480] sm:$0xff] %v683_v15  ;;  %1001 = vst [vmem:[#allocation7 + $0x488] sm:$0xff] %v683_v15 }
  0x77   :  { %1002 = vst [vmem:[#allocation7 + $0x490] sm:$0xff] %v683_v15  ;;  %1003 = vst [vmem:[#allocation7 + $0x498] sm:$0xff] %v683_v15  ;;  %v534_v15 = vcombine.high %v524_v7, %v524_v7 }
  0x78   :  { %1004 = vst [vmem:[#allocation7 + $0x4a0] sm:$0xff] %v687_v21  ;;  %1005 = vst [vmem:[#allocation7 + $0x4a8] sm:$0xff] %v687_v21 }
  0x79   :  { %1006 = vst [vmem:[#allocation7 + $0x4b0] sm:$0xff] %v687_v21  ;;  %1007 = vst [vmem:[#allocation7 + $0x4b8] sm:$0xff] %v687_v21  ;;  %v775_v19 = vrot.slane %v534_v15, %v1233_v8  ;;  %v791_v21 = vrot.slane %v535_v20, %v1233_v8 }
  0x7a   :  { %1008 = vst [vmem:[#allocation7 + $0x4c0] sm:$0xff] %v691_v22  ;;  %1009 = vst [vmem:[#allocation7 + $0x4c8] sm:$0xff] %v691_v22 }
  0x7b   :  { %1010 = vst [vmem:[#allocation7 + $0x4d0] sm:$0xff] %v691_v22  ;;  %1011 = vst [vmem:[#allocation7 + $0x4d8] sm:$0xff] %v691_v22 }
  0x7c   :  { %1016 = vst [vmem:[#allocation7 + $0x500] sm:$0xff] %v699_v26  ;;  %1017 = vst [vmem:[#allocation7 + $0x508] sm:$0xff] %v699_v26 }
  0x7d   :  { %1018 = vst [vmem:[#allocation7 + $0x510] sm:$0xff] %v699_v26  ;;  %1019 = vst [vmem:[#allocation7 + $0x518] sm:$0xff] %v699_v26 }
  0x7e   :  { %1012 = vst [vmem:[#allocation7 + $0x4e0] sm:$0xff] %v695_v30  ;;  %1013 = vst [vmem:[#allocation7 + $0x4e8] sm:$0xff] %v695_v30 }
  0x7f   :  { %1014 = vst [vmem:[#allocation7 + $0x4f0] sm:$0xff] %v695_v30  ;;  %1015 = vst [vmem:[#allocation7 + $0x4f8] sm:$0xff] %v695_v30 }
  0x80   :  { %1020 = vst [vmem:[#allocation7 + $0x520] sm:$0xff] %v703_v37  ;;  %1021 = vst [vmem:[#allocation7 + $0x528] sm:$0xff] %v703_v37 }
  0x81   :  { %1022 = vst [vmem:[#allocation7 + $0x530] sm:$0xff] %v703_v37  ;;  %1023 = vst [vmem:[#allocation7 + $0x538] sm:$0xff] %v703_v37 }
  0x82   :  { %1024 = vst [vmem:[#allocation7 + $0x540] sm:$0xff] %v707_v38  ;;  %1025 = vst [vmem:[#allocation7 + $0x548] sm:$0xff] %v707_v38 }
  0x83   :  { %1026 = vst [vmem:[#allocation7 + $0x550] sm:$0xff] %v707_v38  ;;  %1027 = vst [vmem:[#allocation7 + $0x558] sm:$0xff] %v707_v38 }
  0x84   :  { %1032 = vst [vmem:[#allocation7 + $0x580] sm:$0xff] %v715_v40  ;;  %1033 = vst [vmem:[#allocation7 + $0x588] sm:$0xff] %v715_v40 }
  0x85   :  { %1034 = vst [vmem:[#allocation7 + $0x590] sm:$0xff] %v715_v40  ;;  %1035 = vst [vmem:[#allocation7 + $0x598] sm:$0xff] %v715_v40 }
  0x86   :  { %1048 = vst [vmem:[#allocation7 + $0x600] sm:$0xff] %v731_v43  ;;  %1049 = vst [vmem:[#allocation7 + $0x608] sm:$0xff] %v731_v43 }
  0x87   :  { %1050 = vst [vmem:[#allocation7 + $0x610] sm:$0xff] %v731_v43  ;;  %1051 = vst [vmem:[#allocation7 + $0x618] sm:$0xff] %v731_v43 }
  0x88   :  { %1028 = vst [vmem:[#allocation7 + $0x560] sm:$0xff] %v711_v45  ;;  %1029 = vst [vmem:[#allocation7 + $0x568] sm:$0xff] %v711_v45 }
  0x89   :  { %1030 = vst [vmem:[#allocation7 + $0x570] sm:$0xff] %v711_v45  ;;  %1031 = vst [vmem:[#allocation7 + $0x578] sm:$0xff] %v711_v45 }
  0x8a   :  { %1036 = vst [vmem:[#allocation7 + $0x5a0] sm:$0xff] %v719_v49  ;;  %1037 = vst [vmem:[#allocation7 + $0x5a8] sm:$0xff] %v719_v49 }
  0x8b   :  { %1038 = vst [vmem:[#allocation7 + $0x5b0] sm:$0xff] %v719_v49  ;;  %1039 = vst [vmem:[#allocation7 + $0x5b8] sm:$0xff] %v719_v49 }
  0x8c   :  { %1040 = vst [vmem:[#allocation7 + $0x5c0] sm:$0xff] %v723_v50  ;;  %1041 = vst [vmem:[#allocation7 + $0x5c8] sm:$0xff] %v723_v50 }
  0x8d   :  { %1042 = vst [vmem:[#allocation7 + $0x5d0] sm:$0xff] %v723_v50  ;;  %1043 = vst [vmem:[#allocation7 + $0x5d8] sm:$0xff] %v723_v50 }
  0x8e   :  { %1052 = vst [vmem:[#allocation7 + $0x620] sm:$0xff] %v735_v52  ;;  %1053 = vst [vmem:[#allocation7 + $0x628] sm:$0xff] %v735_v52 }
  0x8f   :  { %1054 = vst [vmem:[#allocation7 + $0x630] sm:$0xff] %v735_v52  ;;  %1055 = vst [vmem:[#allocation7 + $0x638] sm:$0xff] %v735_v52 }
  0x90   :  { %1056 = vst [vmem:[#allocation7 + $0x640] sm:$0xff] %v739_v53  ;;  %1057 = vst [vmem:[#allocation7 + $0x648] sm:$0xff] %v739_v53 }
  0x91   :  { %1058 = vst [vmem:[#allocation7 + $0x650] sm:$0xff] %v739_v53  ;;  %1059 = vst [vmem:[#allocation7 + $0x658] sm:$0xff] %v739_v53 }
  0x92   :  { %1044 = vst [vmem:[#allocation7 + $0x5e0] sm:$0xff] %v727_v56  ;;  %1045 = vst [vmem:[#allocation7 + $0x5e8] sm:$0xff] %v727_v56 }
  0x93   :  { %1046 = vst [vmem:[#allocation7 + $0x5f0] sm:$0xff] %v727_v56  ;;  %1047 = vst [vmem:[#allocation7 + $0x5f8] sm:$0xff] %v727_v56 }
  0x94   :  { %1060 = vst [vmem:[#allocation7 + $0x660] sm:$0xff] %v743_v58  ;;  %1061 = vst [vmem:[#allocation7 + $0x668] sm:$0xff] %v743_v58 }
  0x95   :  { %1062 = vst [vmem:[#allocation7 + $0x670] sm:$0xff] %v743_v58  ;;  %1063 = vst [vmem:[#allocation7 + $0x678] sm:$0xff] %v743_v58 }
  0x96   :  { %1064 = vst [vmem:[#allocation7 + $0x680] sm:$0xff] %v747_v59  ;;  %1065 = vst [vmem:[#allocation7 + $0x688] sm:$0xff] %v747_v59 }
  0x97   :  { %1066 = vst [vmem:[#allocation7 + $0x690] sm:$0xff] %v747_v59  ;;  %1067 = vst [vmem:[#allocation7 + $0x698] sm:$0xff] %v747_v59 }
  0x98   :  { %1068 = vst [vmem:[#allocation7 + $0x6a0] sm:$0xff] %v751_v62  ;;  %1069 = vst [vmem:[#allocation7 + $0x6a8] sm:$0xff] %v751_v62 }
  0x99   :  { %1070 = vst [vmem:[#allocation7 + $0x6b0] sm:$0xff] %v751_v62  ;;  %1071 = vst [vmem:[#allocation7 + $0x6b8] sm:$0xff] %v751_v62 }
  0x9a   :  { %1072 = vst [vmem:[#allocation7 + $0x6c0] sm:$0xff] %v755_v63  ;;  %1073 = vst [vmem:[#allocation7 + $0x6c8] sm:$0xff] %v755_v63 }
  0x9b   :  { %1074 = vst [vmem:[#allocation7 + $0x6d0] sm:$0xff] %v755_v63  ;;  %1075 = vst [vmem:[#allocation7 + $0x6d8] sm:$0xff] %v755_v63 }
  0x9c   :  { %1076 = vst [vmem:[#allocation7 + $0x6e0] sm:$0xff] %v759_v13  ;;  %1077 = vst [vmem:[#allocation7 + $0x6e8] sm:$0xff] %v759_v13 }
  0x9d   :  { %1078 = vst [vmem:[#allocation7 + $0x6f0] sm:$0xff] %v759_v13  ;;  %1079 = vst [vmem:[#allocation7 + $0x6f8] sm:$0xff] %v759_v13 }
  0x9e   :  { %1080 = vst [vmem:[#allocation7 + $0x700] sm:$0xff] %v763_v32  ;;  %1081 = vst [vmem:[#allocation7 + $0x708] sm:$0xff] %v763_v32 }
  0x9f   :  { %1082 = vst [vmem:[#allocation7 + $0x710] sm:$0xff] %v763_v32  ;;  %1083 = vst [vmem:[#allocation7 + $0x718] sm:$0xff] %v763_v32 }
  0xa0   :  { %1084 = vst [vmem:[#allocation7 + $0x720] sm:$0xff] %v767_v12  ;;  %1085 = vst [vmem:[#allocation7 + $0x728] sm:$0xff] %v767_v12 }
  0xa1   :  { %1086 = vst [vmem:[#allocation7 + $0x730] sm:$0xff] %v767_v12  ;;  %1087 = vst [vmem:[#allocation7 + $0x738] sm:$0xff] %v767_v12 }
  0xa2   :  { %1088 = vst [vmem:[#allocation7 + $0x740] sm:$0xff] %v771_v14  ;;  %1089 = vst [vmem:[#allocation7 + $0x748] sm:$0xff] %v771_v14 }
  0xa3   :  { %1090 = vst [vmem:[#allocation7 + $0x750] sm:$0xff] %v771_v14  ;;  %1091 = vst [vmem:[#allocation7 + $0x758] sm:$0xff] %v771_v14 }
  0xa4   :  { %1096 = vst [vmem:[#allocation7 + $0x780] sm:$0xff] %v779_v16  ;;  %1097 = vst [vmem:[#allocation7 + $0x788] sm:$0xff] %v779_v16 }
  0xa5   :  { %1098 = vst [vmem:[#allocation7 + $0x790] sm:$0xff] %v779_v16  ;;  %1099 = vst [vmem:[#allocation7 + $0x798] sm:$0xff] %v779_v16 }
  0xa6   :  { %1092 = vst [vmem:[#allocation7 + $0x760] sm:$0xff] %v775_v19  ;;  %1093 = vst [vmem:[#allocation7 + $0x768] sm:$0xff] %v775_v19 }
  0xa7   :  { %1094 = vst [vmem:[#allocation7 + $0x770] sm:$0xff] %v775_v19  ;;  %1095 = vst [vmem:[#allocation7 + $0x778] sm:$0xff] %v775_v19 }
  0xa8   :  { %1100 = vst [vmem:[#allocation7 + $0x7a0] sm:$0xff] %v783_v33  ;;  %1101 = vst [vmem:[#allocation7 + $0x7a8] sm:$0xff] %v783_v33 }
  0xa9   :  { %1102 = vst [vmem:[#allocation7 + $0x7b0] sm:$0xff] %v783_v33  ;;  %1103 = vst [vmem:[#allocation7 + $0x7b8] sm:$0xff] %v783_v33 }
  0xaa   :  { %1104 = vst [vmem:[#allocation7 + $0x7c0] sm:$0xff] %v787_v5  ;;  %1105 = vst [vmem:[#allocation7 + $0x7c8] sm:$0xff] %v787_v5 }
  0xab   :  { %1106 = vst [vmem:[#allocation7 + $0x7d0] sm:$0xff] %v787_v5  ;;  %1107 = vst [vmem:[#allocation7 + $0x7d8] sm:$0xff] %v787_v5 }
  0xac   :  { %1108 = vst [vmem:[#allocation7 + $0x7e0] sm:$0xff] %v791_v21  ;;  %1109 = vst [vmem:[#allocation7 + $0x7e8] sm:$0xff] %v791_v21 }
  0xad   :  { %1110 = vst [vmem:[#allocation7 + $0x7f0] sm:$0xff] %v791_v21  ;;  %1111 = vst [vmem:[#allocation7 + $0x7f8] sm:$0xff] %v791_v21 }
  0xae   :  { %1188 = shalt.err (!%p1185_p0)
}
  0xaf   :  { %s1207_s20 = smov 128   ;;  %s1208_s21 = smov 8  }
  0xb0   :  { %1123 = dma.vmem_to_hbm [thread:$0]  %s1118_s1, 32768, %s1414_s2, [#allocation4], %s1207_s20, %s1207_s20, %s1208_s21  }
  0xb1   :  { %1201 = dma.done.wait [#allocation4], 32768  }
  0xb2   :  { %1202 = vsyncadd [#allocation4], 4294934528 }
  0xb3   :  { %1127 = vsyncpa [#allocation3], 1 }
  0xb4   :  { %1128 = vsyncpa [#allocation6], 1 }
  0xb5   :  { %1129 = vsyncpa [#allocation4], 1 }

</bundles_post_ra>
